<compile_context>
chip_gen: v6e
topology: v6e:2x2x1
jax: 0.10.0
libtpu: 0.0.40
codegen_flags: <defaults>
</compile_context>

<pallas_src>
import jax
import jax.numpy as jnp
import numpy as np
from jax.experimental import pallas as pl
from jax.experimental.pallas import tpu as pltpu


def _make_bottleneck_kernel(Wp):
    """Wp = padded image width (W + 2); fixes the 9 tap offsets."""
    offsets = [(dy - 1) * Wp + (dx - 1) for dy in range(3) for dx in range(3)]
    # zero-extension width for the tap shifts (must cover max |offset|)
    ext = ((Wp + 1 + 127) // 128) * 128

    def kernel(xp_ref, s1_ref, t1_ref, w1_ref, b1_ref,
               w3_ref, b3_ref, w2_ref, b2_ref, o_ref):
        cdt = w1_ref.dtype                          # matmul compute dtype (bf16)
        P = w1_ref.shape[0]
        L = xp_ref.shape[2]                         # lane-padded pixel count

        xp = xp_ref[0].astype(jnp.float32)          # (Cin, L) lane-dense

        # --- BN1 + ReLU (eval-mode BN folded to per-channel scale/shift) ---
        h0 = jnp.maximum(xp * s1_ref[...] + t1_ref[...], 0.0)

        # --- conv1 1x1 (BN2 pre-folded into w1/b1) + ReLU  ->  (P, L) ---
        h1 = jnp.dot(w1_ref[...], h0.astype(cdt),
                     preferred_element_type=jnp.float32) + b1_ref[...]
        h1 = jnp.maximum(h1, 0.0)

        # --- 3x3 conv (BN3 pre-folded) as ONE fused im2col matmul ---
        # Each tap is a static lane shift of the flattened reflection-padded
        # plane, realised as a slice of a zero-extended copy (values that fall
        # outside the plane only reach the discarded halo ring / zero tail).
        zpad = jnp.zeros((P, ext), jnp.float32)
        h1e = jnp.concatenate([zpad, h1, zpad], axis=1)          # (P, L + 2*ext)
        patches = jnp.concatenate(
            [h1e[:, ext + o: ext + o + L] for o in offsets], axis=0)  # (9P, L)
        h2 = jnp.dot(w3_ref[...], patches.astype(cdt),
                     preferred_element_type=jnp.float32) + b3_ref[...]
        h2 = jnp.maximum(h2, 0.0)

        # --- conv3 1x1 + identity residual (downsample=None) ---
        out = jnp.dot(w2_ref[...], h2.astype(cdt),
                      preferred_element_type=jnp.float32) + b2_ref[...]
        o_ref[0] = (out + xp).astype(o_ref.dtype)

    return kernel


def bottleneck_forward(x_nchw, p, compute_dtype=jnp.bfloat16):
    N, Cin, H, W = x_nchw.shape
    P = p["w1"].shape[1]
    Cout = p["w2"].shape[1]
    assert Cout == Cin, "identity residual requires inplanes == planes * 4"
    Hp, Wp = H + 2, W + 2
    L = ((Hp * Wp + 127) // 128) * 128          # lane-dense flattened plane

    # ReflectionPad2d(1) in the wrapper: it commutes with the pointwise stages
    # ahead of the 3x3 conv. Flatten the padded plane onto the lane axis and
    # zero-pad it to a multiple of 128 (NCHW -> (N, C, pixels), no transpose).
    xp = jnp.pad(x_nchw, ((0, 0), (0, 0), (1, 1), (1, 1)), mode="reflect")
    xp = xp.reshape(N, Cin, Hp * Wp)
    xp = jnp.pad(xp, ((0, 0), (0, 0), (0, L - Hp * Wp)))

    # Fold BN2 into conv1 and BN3 into conv2; weights stored as (out, in) and
    # cast to the matmul compute dtype (bf16), biases/scales stay f32.
    s2, t2 = p["s2"][0], p["t2"][0]
    s3, t3 = p["s3"][0], p["t3"][0]
    w1f = (p["w1"] * s2[None, :]).T.astype(compute_dtype)            # (P, Cin)
    b1f = (p["b1"][0] * s2 + t2).reshape(P, 1).astype(jnp.float32)   # (P, 1)
    w3f = jnp.transpose(p["w3"] * s3[None, None, :], (2, 0, 1))      # (P, 9, P)
    w3f = w3f.reshape(P, 9 * P).astype(compute_dtype)                # (P, 9P)
    b3f = (p["b3"][0] * s3 + t3).reshape(P, 1).astype(jnp.float32)   # (P, 1)
    w2t = p["w2"].T.astype(compute_dtype)                            # (Cout, P)
    b2 = p["b2"][0].reshape(Cout, 1).astype(jnp.float32)             # (Cout, 1)
    s1 = p["s1"].reshape(Cin, 1)
    t1 = p["t1"].reshape(Cin, 1)

    def const_spec(a):
        zeros = (0,) * a.ndim
        return pl.BlockSpec(a.shape, lambda b, _z=zeros: _z)

    params = (s1, t1, w1f, b1f, w3f, b3f, w2t, b2)
    in_specs = [pl.BlockSpec((1, Cin, L), lambda b: (b, 0, 0))]
    in_specs += [const_spec(a) for a in params]

    out_flat = pl.pallas_call(
        _make_bottleneck_kernel(Wp),
        out_shape=jax.ShapeDtypeStruct((N, Cout, L), x_nchw.dtype),
        grid=(N,),                               # N=2 also feeds both v7x TCs
        in_specs=in_specs,
        out_specs=pl.BlockSpec((1, Cout, L), lambda b: (b, 0, 0)),
        compiler_params=pltpu.CompilerParams(dimension_semantics=("parallel",)),
    )(xp, *params)

    # Drop the zero tail and the reflection halo; result is already NCHW.
    out = out_flat[:, :, :Hp * Wp].reshape(N, Cout, Hp, Wp)
    return out[:, :, 1:H + 1, 1:W + 1]


def make_params(key, inplanes, planes):
    eps = 1e-5
    expansion = 4
    ks = list(jax.random.split(key, 18))

    def bn(kg, kb, km, kv, c):
        gamma = 1.0 + 0.1 * jax.random.normal(kg, (c,), jnp.float32)
        beta = 0.1 * jax.random.normal(kb, (c,), jnp.float32)
        mean = 0.1 * jax.random.normal(km, (c,), jnp.float32)
        var = 1.0 + 0.1 * jnp.abs(jax.random.normal(kv, (c,), jnp.float32))
        scale = gamma / jnp.sqrt(var + eps)
        shift = beta - mean * scale
        return scale.reshape(1, c), shift.reshape(1, c)

    s1, t1 = bn(ks[0], ks[1], ks[2], ks[3], inplanes)
    s2, t2 = bn(ks[4], ks[5], ks[6], ks[7], planes)
    s3, t3 = bn(ks[8], ks[9], ks[10], ks[11], planes)

    w1 = jax.random.normal(ks[12], (inplanes, planes), jnp.float32) / np.sqrt(inplanes)
    b1 = 0.1 * jax.random.normal(ks[13], (1, planes), jnp.float32)
    w3 = jax.random.normal(ks[14], (9, planes, planes), jnp.float32) / np.sqrt(9 * planes)
    b3 = 0.1 * jax.random.normal(ks[15], (1, planes), jnp.float32)
    w2 = jax.random.normal(ks[16], (planes, planes * expansion), jnp.float32) / np.sqrt(planes)
    b2 = 0.1 * jax.random.normal(ks[17], (1, planes * expansion), jnp.float32)

    return dict(s1=s1, t1=t1, s2=s2, t2=t2, s3=s3, t3=t3,
                w1=w1, b1=b1, w3=w3, b3=b3, w2=w2, b2=b2)


def reference(x_nchw, p):
    """Pure-JAX f32 reference of the same forward pass (eval-mode BN)."""
    x = jnp.transpose(x_nchw, (0, 2, 3, 1)).astype(jnp.float32)
    N, H, W, Cin = x.shape
    P = p["w1"].shape[1]
    h = jnp.maximum(x * p["s1"][0] + p["t1"][0], 0.0)
    h = jnp.einsum("nhwc,cp->nhwp", h, p["w1"], precision="highest") + p["b1"][0]
    h = jnp.maximum(h * p["s2"][0] + p["t2"][0], 0.0)
    hp = jnp.pad(h, ((0, 0), (1, 1), (1, 1), (0, 0)), mode="reflect")
    acc = jnp.zeros((N, H, W, P), jnp.float32) + p["b3"][0]
    for dy in range(3):
        for dx in range(3):
            acc = acc + jnp.einsum("nhwc,cp->nhwp",
                                   hp[:, dy:dy + H, dx:dx + W, :],
                                   p["w3"][dy * 3 + dx], precision="highest")
    h = jnp.maximum(acc * p["s3"][0] + p["t3"][0], 0.0)
    out = jnp.einsum("nhwc,cp->nhwp", h, p["w2"], precision="highest") + p["b2"][0]
    out = out + x
    return jnp.transpose(out, (0, 3, 1, 2))


if __name__ == "__main__":
    planes = 4
    inplanes = planes * 4   # identity residual (downsample=None) requires this
    N, H, W = 2, 16, 16

    key = jax.random.PRNGKey(0)
    kx, kp = jax.random.split(key)
    x = jax.random.normal(kx, (N, inplanes, H, W), jnp.float32)   # NCHW like PyTorch
    params = make_params(kp, inplanes, planes)

    out = jax.block_until_ready(bottleneck_forward(x, params))
    ref = reference(x, params)

    # Kernel uses bf16 MXU operands (f32 accumulate); reference is f32 'highest'.
    np.testing.assert_allclose(np.asarray(out), np.asarray(ref), rtol=2e-2, atol=5e-2)

    print("KERNEL_OK")
</pallas_src>

<mosaic_0001>
module attributes {stable_mosaic.version = 11 : i64} {
  func.func @kernel(%arg0: i32, %arg1: memref<1x16x384xf32, #tpu.memory_space<vmem>>, %arg2: memref<16x1xf32, #tpu.memory_space<vmem>>, %arg3: memref<16x1xf32, #tpu.memory_space<vmem>>, %arg4: memref<4x16xbf16, #tpu.memory_space<vmem>>, %arg5: memref<4x1xf32, #tpu.memory_space<vmem>>, %arg6: memref<4x36xbf16, #tpu.memory_space<vmem>>, %arg7: memref<4x1xf32, #tpu.memory_space<vmem>>, %arg8: memref<16x4xbf16, #tpu.memory_space<vmem>>, %arg9: memref<16x1xf32, #tpu.memory_space<vmem>>, %arg10: memref<1x16x384xf32, #tpu.memory_space<vmem>>) attributes {dimension_semantics = [#tpu.dimension_semantics<parallel>], iteration_bounds = array<i64: 2>, scalar_prefetch = 0 : i64, scratch_operands = 0 : i64, tpu.core_type = #tpu.core_type<tc>, window_params = [{transform_indices = @transform_0, window_bounds = array<i64: 1, 16, 384>}, {pipeline_mode = #tpu.pipeline_mode<synchronous>, transform_indices = @transform_1, window_bounds = array<i64: 16, 1>}, {pipeline_mode = #tpu.pipeline_mode<synchronous>, transform_indices = @transform_2, window_bounds = array<i64: 16, 1>}, {pipeline_mode = #tpu.pipeline_mode<synchronous>, transform_indices = @transform_3, window_bounds = array<i64: 4, 16>}, {pipeline_mode = #tpu.pipeline_mode<synchronous>, transform_indices = @transform_4, window_bounds = array<i64: 4, 1>}, {pipeline_mode = #tpu.pipeline_mode<synchronous>, transform_indices = @transform_5, window_bounds = array<i64: 4, 36>}, {pipeline_mode = #tpu.pipeline_mode<synchronous>, transform_indices = @transform_6, window_bounds = array<i64: 4, 1>}, {pipeline_mode = #tpu.pipeline_mode<synchronous>, transform_indices = @transform_7, window_bounds = array<i64: 16, 4>}, {pipeline_mode = #tpu.pipeline_mode<synchronous>, transform_indices = @transform_8, window_bounds = array<i64: 16, 1>}, {transform_indices = @transform_9, window_bounds = array<i64: 1, 16, 384>}]} {
    %c0 = arith.constant 0 : index
    %c0_0 = arith.constant 0 : index
    %c0_1 = arith.constant 0 : index
    %0 = vector.load %arg1[%c0, %c0_0, %c0_1] : memref<1x16x384xf32, #tpu.memory_space<vmem>>, vector<1x16x384xf32>
    %1 = vector.shape_cast %0 : vector<1x16x384xf32> to vector<16x384xf32>
    %c0_2 = arith.constant 0 : index
    %c0_3 = arith.constant 0 : index
    %2 = vector.load %arg2[%c0_2, %c0_3] : memref<16x1xf32, #tpu.memory_space<vmem>>, vector<16x1xf32>
    %3 = vector.broadcast %2 : vector<16x1xf32> to vector<16x384xf32>
    %4 = arith.mulf %1, %3 : vector<16x384xf32>
    %c0_4 = arith.constant 0 : index
    %c0_5 = arith.constant 0 : index
    %5 = vector.load %arg3[%c0_4, %c0_5] : memref<16x1xf32, #tpu.memory_space<vmem>>, vector<16x1xf32>
    %6 = vector.broadcast %5 : vector<16x1xf32> to vector<16x384xf32>
    %7 = arith.addf %4, %6 : vector<16x384xf32>
    %cst = arith.constant 0.000000e+00 : f32
    %8 = vector.broadcast %cst : f32 to vector<16x384xf32>
    %9 = arith.maximumf %7, %8 : vector<16x384xf32>
    %c0_6 = arith.constant 0 : index
    %c0_7 = arith.constant 0 : index
    %10 = vector.load %arg4[%c0_6, %c0_7] : memref<4x16xbf16, #tpu.memory_space<vmem>>, vector<4x16xbf16>
    %11 = arith.truncf %9 : vector<16x384xf32> to vector<16x384xbf16>
    %cst_8 = arith.constant dense<0.000000e+00> : vector<4x384xf32>
    %12 = tpu.matmul %10, %11, %cst_8 {dimension_numbers = #tpu.dot_dimension_numbers<[1], [0], [0], [1], [0, 0, 1, 1], [], []>} : vector<4x16xbf16>, vector<16x384xbf16>, vector<4x384xf32> -> vector<4x384xf32>
    %c0_9 = arith.constant 0 : index
    %c0_10 = arith.constant 0 : index
    %13 = vector.load %arg5[%c0_9, %c0_10] : memref<4x1xf32, #tpu.memory_space<vmem>>, vector<4x1xf32>
    %14 = vector.broadcast %13 : vector<4x1xf32> to vector<4x384xf32>
    %15 = arith.addf %12, %14 : vector<4x384xf32>
    %cst_11 = arith.constant 0.000000e+00 : f32
    %16 = vector.broadcast %cst_11 : f32 to vector<4x384xf32>
    %17 = arith.maximumf %15, %16 : vector<4x384xf32>
    %cst_12 = arith.constant 0.000000e+00 : f32
    %18 = vector.broadcast %cst_12 : f32 to vector<4x128xf32>
    %19 = tpu.concatenate %18, %17, %18 in 1 : vector<4x128xf32>, vector<4x384xf32>, vector<4x128xf32> -> vector<4x640xf32>
    %20 = vector.extract_strided_slice %19 {offsets = [0, 109], sizes = [4, 384], strides = [1, 1]} : vector<4x640xf32> to vector<4x384xf32>
    %21 = vector.extract_strided_slice %19 {offsets = [0, 110], sizes = [4, 384], strides = [1, 1]} : vector<4x640xf32> to vector<4x384xf32>
    %22 = vector.extract_strided_slice %19 {offsets = [0, 111], sizes = [4, 384], strides = [1, 1]} : vector<4x640xf32> to vector<4x384xf32>
    %23 = vector.extract_strided_slice %19 {offsets = [0, 127], sizes = [4, 384], strides = [1, 1]} : vector<4x640xf32> to vector<4x384xf32>
    %24 = vector.extract_strided_slice %19 {offsets = [0, 128], sizes = [4, 384], strides = [1, 1]} : vector<4x640xf32> to vector<4x384xf32>
    %25 = vector.extract_strided_slice %19 {offsets = [0, 129], sizes = [4, 384], strides = [1, 1]} : vector<4x640xf32> to vector<4x384xf32>
    %26 = vector.extract_strided_slice %19 {offsets = [0, 145], sizes = [4, 384], strides = [1, 1]} : vector<4x640xf32> to vector<4x384xf32>
    %27 = vector.extract_strided_slice %19 {offsets = [0, 146], sizes = [4, 384], strides = [1, 1]} : vector<4x640xf32> to vector<4x384xf32>
    %28 = vector.extract_strided_slice %19 {offsets = [0, 147], sizes = [4, 384], strides = [1, 1]} : vector<4x640xf32> to vector<4x384xf32>
    %29 = tpu.concatenate %20, %21, %22, %23, %24, %25, %26, %27, %28 in 0 : vector<4x384xf32>, vector<4x384xf32>, vector<4x384xf32>, vector<4x384xf32>, vector<4x384xf32>, vector<4x384xf32>, vector<4x384xf32>, vector<4x384xf32>, vector<4x384xf32> -> vector<36x384xf32>
    %c0_13 = arith.constant 0 : index
    %c0_14 = arith.constant 0 : index
    %30 = vector.load %arg6[%c0_13, %c0_14] : memref<4x36xbf16, #tpu.memory_space<vmem>>, vector<4x36xbf16>
    %31 = arith.truncf %29 : vector<36x384xf32> to vector<36x384xbf16>
    %cst_15 = arith.constant dense<0.000000e+00> : vector<4x384xf32>
    %32 = tpu.matmul %30, %31, %cst_15 {dimension_numbers = #tpu.dot_dimension_numbers<[1], [0], [0], [1], [0, 0, 1, 1], [], []>} : vector<4x36xbf16>, vector<36x384xbf16>, vector<4x384xf32> -> vector<4x384xf32>
    %c0_16 = arith.constant 0 : index
    %c0_17 = arith.constant 0 : index
    %33 = vector.load %arg7[%c0_16, %c0_17] : memref<4x1xf32, #tpu.memory_space<vmem>>, vector<4x1xf32>
    %34 = vector.broadcast %33 : vector<4x1xf32> to vector<4x384xf32>
    %35 = arith.addf %32, %34 : vector<4x384xf32>
    %cst_18 = arith.constant 0.000000e+00 : f32
    %36 = vector.broadcast %cst_18 : f32 to vector<4x384xf32>
    %37 = arith.maximumf %35, %36 : vector<4x384xf32>
    %c0_19 = arith.constant 0 : index
    %c0_20 = arith.constant 0 : index
    %38 = vector.load %arg8[%c0_19, %c0_20] : memref<16x4xbf16, #tpu.memory_space<vmem>>, vector<16x4xbf16>
    %39 = arith.truncf %37 : vector<4x384xf32> to vector<4x384xbf16>
    %cst_21 = arith.constant dense<0.000000e+00> : vector<16x384xf32>
    %40 = tpu.matmul %38, %39, %cst_21 {dimension_numbers = #tpu.dot_dimension_numbers<[1], [0], [0], [1], [0, 0, 1, 1], [], []>} : vector<16x4xbf16>, vector<4x384xbf16>, vector<16x384xf32> -> vector<16x384xf32>
    %c0_22 = arith.constant 0 : index
    %c0_23 = arith.constant 0 : index
    %41 = vector.load %arg9[%c0_22, %c0_23] : memref<16x1xf32, #tpu.memory_space<vmem>>, vector<16x1xf32>
    %42 = vector.broadcast %41 : vector<16x1xf32> to vector<16x384xf32>
    %43 = arith.addf %40, %42 : vector<16x384xf32>
    %44 = arith.addf %43, %1 : vector<16x384xf32>
    %c0_24 = arith.constant 0 : index
    %c0_25 = arith.constant 0 : index
    %c0_26 = arith.constant 0 : index
    %45 = vector.load %arg10[%c0_24, %c0_25, %c0_26] : memref<1x16x384xf32, #tpu.memory_space<vmem>>, vector<1x16x384xf32>
    %46 = vector.shape_cast %45 : vector<1x16x384xf32> to vector<16x384xf32>
    %47 = vector.shape_cast %44 : vector<16x384xf32> to vector<1x16x384xf32>
    tpu.vector_store %arg10[%c0_24, %c0_25, %c0_26], %47 {strides = array<i32>} : memref<1x16x384xf32, #tpu.memory_space<vmem>>, vector<1x16x384xf32>,
    return
  }
  func.func @transform_0(%arg0: i32) -> (i32, i32, i32) {
    %c0_i32 = arith.constant 0 : i32
    %c0_i32_0 = arith.constant 0 : i32
    %c0_i32_1 = arith.constant 0 : i32
    return %arg0, %c0_i32, %c0_i32_0 : i32, i32, i32
  }
  func.func @transform_1(%arg0: i32) -> (i32, i32) {
    %c0_i32 = arith.constant 0 : i32
    %c0_i32_0 = arith.constant 0 : i32
    %c0_i32_1 = arith.constant 0 : i32
    return %c0_i32, %c0_i32_0 : i32, i32
  }
  func.func @transform_2(%arg0: i32) -> (i32, i32) {
    %c0_i32 = arith.constant 0 : i32
    %c0_i32_0 = arith.constant 0 : i32
    %c0_i32_1 = arith.constant 0 : i32
    return %c0_i32, %c0_i32_0 : i32, i32
  }
  func.func @transform_3(%arg0: i32) -> (i32, i32) {
    %c0_i32 = arith.constant 0 : i32
    %c0_i32_0 = arith.constant 0 : i32
    %c0_i32_1 = arith.constant 0 : i32
    return %c0_i32, %c0_i32_0 : i32, i32
  }
  func.func @transform_4(%arg0: i32) -> (i32, i32) {
    %c0_i32 = arith.constant 0 : i32
    %c0_i32_0 = arith.constant 0 : i32
    %c0_i32_1 = arith.constant 0 : i32
    return %c0_i32, %c0_i32_0 : i32, i32
  }
  func.func @transform_5(%arg0: i32) -> (i32, i32) {
    %c0_i32 = arith.constant 0 : i32
    %c0_i32_0 = arith.constant 0 : i32
    %c0_i32_1 = arith.constant 0 : i32
    return %c0_i32, %c0_i32_0 : i32, i32
  }
  func.func @transform_6(%arg0: i32) -> (i32, i32) {
    %c0_i32 = arith.constant 0 : i32
    %c0_i32_0 = arith.constant 0 : i32
    %c0_i32_1 = arith.constant 0 : i32
    return %c0_i32, %c0_i32_0 : i32, i32
  }
  func.func @transform_7(%arg0: i32) -> (i32, i32) {
    %c0_i32 = arith.constant 0 : i32
    %c0_i32_0 = arith.constant 0 : i32
    %c0_i32_1 = arith.constant 0 : i32
    return %c0_i32, %c0_i32_0 : i32, i32
  }
  func.func @transform_8(%arg0: i32) -> (i32, i32) {
    %c0_i32 = arith.constant 0 : i32
    %c0_i32_0 = arith.constant 0 : i32
    %c0_i32_1 = arith.constant 0 : i32
    return %c0_i32, %c0_i32_0 : i32, i32
  }
  func.func @transform_9(%arg0: i32) -> (i32, i32, i32) {
    %c0_i32 = arith.constant 0 : i32
    %c0_i32_0 = arith.constant 0 : i32
    %c0_i32_1 = arith.constant 0 : i32
    return %arg0, %c0_i32, %c0_i32_0 : i32, i32, i32
  }
}

</mosaic_0001>

<bundles_post_ra>
// kernel: tpu_custom_call.1
= control target key start
LH: loop header
LB: loop body
LE: loop exit
PB: predicated region body
PF: predicated region fallthrough
CT: control target
= control target key end

     0   :  { %14 = vsyncpa [#allocation3], 0  ;;  %s1722_s0 = inlined_call_operand.hbm [shape: f32[2,16,384], index: 0, kind: input, shape index: {}]   ;;  %s1723_s1 = inlined_call_operand.vmem [shape: f32[16,1], index: 1, kind: input, shape index: {}]   ;;  %s1724_s2 = inlined_call_operand.vmem [shape: f32[16,1], index: 2, kind: input, shape index: {}]   ;;  %s1725_s3 = inlined_call_operand.vmem [shape: bf16[4,16], index: 3, kind: input, shape index: {}]   ;;  %s1726_s4 = inlined_call_operand.vmem [shape: f32[4,1], index: 4, kind: input, shape index: {}]   ;;  %s1727_s5 = inlined_call_operand.vmem [shape: bf16[4,36], index: 5, kind: input, shape index: {}]   ;;  %s1728_s6 = inlined_call_operand.vmem [shape: f32[4,1], index: 6, kind: input, shape index: {}]   ;;  %s1729_s7 = inlined_call_operand.vmem [shape: bf16[16,4], index: 7, kind: input, shape index: {}]   ;;  %s1730_s8 = inlined_call_operand.vmem [shape: f32[16,1], index: 8, kind: input, shape index: {}]   ;;  %s1731_s9 = inlined_call_operand.hbm [shape: f32[2,16,384], index: 9, kind: output, shape index: {}]  }
   0x1   :  { %16 = vsyncpa [#allocation3 + $0x1], 0 }
   0x2   :  { %17 = vsyncpa [#allocation4], 0 }
   0x3   :  { %19 = vsyncpa [#allocation4 + $0x1], 0  ;;  %s1378_s30 = smov 0   ;;  %s1380_s10 = smov 0  }
   0x4   :  { %s1382_s11 = smov 0   ;;  %s1384_s12 = smov 0  }
   0x5 LB: > { %1735 = sst [smem:[#allocation8_spill]] %s1304_s11  ;;  %s1399_s13 = sadd.s32 4294967295, %s1308_s12   ;;  %s1308_s12 = sphi %s1384_s12, %s1749_s12   ;;  %s1304_s11 = sphi %s1382_s11, %s1746_s11   ;;  %s1300_s10 = sphi %s1380_s10, %s1748_s10   ;;  %s1296_s30 = sphi %s1378_s30, %s1747_s30  }
   0x6   : > { %s1035_s14 = sadd.s32 4294967294, %s1308_s12   ;;  %s1403_s15 = sadd.s32 1, %s1308_s12  }
   0x7   : > { %s32_s16 = sadd.s32 1, %s1304_s11  ;;  %s29_s17 = ssub.s32 %s1308_s12, %s1403_s15 }
   0x8   : > { %p39_p0 = scmp.ne.s32.totalorder %s1304_s11, %s1300_s10  ;;  %p30_p1 = scmp.eq.s32.totalorder %s29_s17, 0 }
   0x9   : > { %p40_p2 = scmp.eq.s32.totalorder %s1308_s12, 0  ;;  %p45_p3 = scmp.ne.s32.totalorder %s1300_s10, %s1296_s30 }
   0xa   : > { %p46_p4 = scmp.eq.s32.totalorder %s1399_s13, 0  ;;  %p237_p7 = scmp.eq.s32.totalorder %s1399_s13, 1 }
   0xb   : > { %s1415_s18 = scalar_select %p30_p1, %s1304_s11, %s32_s16  }
   0xc   : > { %p41_p5 = por %p40_p2, %p39_p0  ;;  %p1417_p6 = por %p46_p4, %p45_p3 }
   0xd   : > { %1736 = sst [smem:[#allocation9_spill]] %s1415_s18  ;;  %p243_p8 = scmp.eq.s32.totalorder %s1035_s14, 1 }
   0xe   : > { %s1737_s19 = scalar_select %p1417_p6, 1, 0 }
   0xf   : > { %p1098_p10 = scmp.lt.s32.totalorder %s1308_s12, 2  ;;  %p1424_p11 = por %p237_p7, %p39_p0 }
  0x10   : > { %p1428_p12 = por %p243_p8, %p45_p3  ;;  %s287_s22 = sand.u32 1, %s1304_s11  }
  0x11   : > { %s1738_s20 = scalar_select %p1424_p11, 1, 0 }
  0x12   : > { %s1739_s21 = scalar_select %p1428_p12, 1, 0 }
  0x13   : > { %s1083_s23 = smul.u32 768, %s1308_s12  ;;  %p1439_p13 = pnand %p1098_p10, %p41_p5 }
  0x14   : > { %s1082_s24 = smul.u32 48, %s287_s22  ;;  %s1445_s16 = scalar_lea.sflag [#allocation3], %s287_s22 }
  0x15   : > { %s1437_s27 = scalar_lea.hbm %s1722_s0, %s1083_s23  ;;  %p1218_p1 = pneg %p1439_p13 }
  0x16   : > { %s291_s29 = scalar_lea.vmem [#allocation2], %s1082_s24  ;;  %s1216_s17 = scalar_lea.hbm %s1437_s27, 768 }
  0x17   : > { %s298_s14 = sshll.u32 %s291_s29, 4  ;;  %p1217_p0 = scmp.ne.s32.totalorder %s1437_s27, %s1216_s17  ;;  %s1443_s14 = int_to_ptr.vmem [resolvable:$true] %s298_s14 }
  0x18   : > { %s1221_s26 = scalar_lea.hbm %s1722_s0, 1536  ;;  %p1222_p4 = scmp.lt.s32.totalorder %s1437_s27, %s1722_s0 }
  0x19   : > { %p1219_p2 = pnand %p1218_p1, %p1217_p0  ;;  %p1223_p5 = scmp.lt.s32.totalorder %s1221_s26, %s1216_s17 }
  0x1b   : > { %p1220_p3 = pneg %p1219_p2  ;;  %p1224_p7 = por %p1223_p5, %p1222_p4 }
  0x1d   : > { %p1225_p8 = pnand %p1224_p7, %p1220_p3 }
  0x1f   : > { %1228 = shalt.err (!%p1225_p8)
}
  0x20   : > { %s1229_s22 = scalar_lea.vmem %s1443_s14, 768  ;;  %s1310_s24 = smov [#allocation2]  }
  0x21   : > { %p1230_p10 = scmp.ne.s32.totalorder %s1443_s14, %s1229_s22  ;;  %s1234_s29 = sshll.u32 %s1310_s24, 4  ;;  %s1235_s29 = int_to_ptr.vmem [resolvable:$false] %s1234_s29 }
  0x22   : > { %s1236_s23 = scalar_lea.vmem %s1235_s29, 1536  ;;  %p1237_p2 = scmp.lt.s32.totalorder %s1443_s14, %s1235_s29 }
  0x23   : > { %p1232_p9 = pnand %p1230_p10, %p1218_p1  ;;  %p1238_p12 = scmp.lt.s32.totalorder %s1236_s23, %s1229_s22 }
  0x25   : > { %p1233_p0 = pneg %p1232_p9  ;;  %p1239_p11 = por %p1238_p12, %p1237_p2 }
  0x27   : > { %p1240_p6 = pnand %p1239_p11, %p1233_p0 }
  0x29   : > { %1243 = shalt.err (!%p1240_p6)
}
  0x2a   : > { %s1311_s11 = smov 384   ;;  %s1312_s18 = smov 24  }
  0x2b   : > { %1093 = dma.hbm_to_vmem [thread:$0]  (!%p1439_p13), %s1437_s27, 768, %s1443_s14, %s1445_s16, %s1311_s11, %s1311_s11, %s1312_s18  }
  0x2c   : > { %p1039_p9 = scmp.ge.s32.totalorder %s1308_s12, 1  ;;  %p306_p1 = scmp.lt.s32.totalorder %s1308_s12, 3 }
  0x2e   : > { %p307_p3 = pnand %p1039_p9, %p306_p1 }
  0x2f   : > { %s1469_s17 = sand.u32 (!%p307_p3), 1, %s1300_s10   ;;  %p1741_p6 = scmp.ne.s32.totalorder (!%p307_p3), %s1737_s19, 0 }
  0x30   : > { %310 = sbr.rel (%p307_p3) target bundleno = 1092 (0x444), region = 56  ;;  %s313_s26 = scalar_lea.sflag (!%p307_p3), [#allocation3], %s1469_s17 }
  0x31   : > { %s1084_s25 = smul.u32 (!%p307_p3), 48, %s1469_s17 }
  0x33   : > { %s1475_s22 = scalar_lea.vmem (!%p307_p3), [#allocation2], %s1084_s25 }
  0x35   : > { %1287 = dma.done.wait (%p1741_p6), %s313_s26, 768  }
  0x36   : > { %1289 = vsyncadd (%p1741_p6), %s313_s26, 4294966528  ;;  %v1313_v0 = vmov 0   ;;  %v376_v1 = vld [vmem:[%s1724_s2] sm:$0xff]  ;;  %v377_v3 = vld [vmem:[%s1724_s2 + $0x8] sm:$0xff]  ;;  %v1314_v6 = vmov 0.0   ;;  %vm1315_vm0 = vmmov 0  }
  0x37   : > { %1149 = vset.pattern.permute.xlu1 %v1313_v0  ;;  %1148 = vset.pattern.permute.xlu0 %v1313_v0  ;;  %v358_v2 = vld [vmem:[%s1723_s1] sm:$0xff]  ;;  %v359_v4 = vld [vmem:[%s1723_s1 + $0x8] sm:$0xff]  ;;  %vm410_vm1 = vcmask 130048   ;;  %s1316_s27 = smov 90   ;;  %s1317_s28 = smov 109   ;;  %v502_v56 = vrot.slane %v1314_v6, 4 }
  0x38   : > { %446 = vmatprep.mubr.bf16.mxu0 %v1313_v0  ;;  %380 = vperm.xlu1 %1149, %v376_v1   ;;  %v404_v5 = vld [vmem:[%s1726_s4] sm:$0xf]  ;;  %v1506_v8 = vld [vmem:[%s1475_s22 + $0x8] sm:$0xff]  ;;  %v1515_v15 = vld [vmem:[%s1475_s22 + $0x18] sm:$0xff]  ;;  %s1318_s14 = smov 92   ;;  %s1319_s16 = smov 126  }
  0x39   : > { %362 = vperm.xlu0 %1148, %v358_v2   ;;  %1060 = vmatprep.subr.bf16.mxu1 %v1314_v6  ;;  %v1503_v7 = vld [vmem:[%s1475_s22] sm:$0xff]  ;;  %v1509_v9 = vld [vmem:[%s1475_s22 + $0x10] sm:$0xff]  ;;  %v1521_v17 = vld [vmem:[%s1475_s22 + $0x28] sm:$0xff]  ;;  %s1320_s19 = smov 108   ;;  %s1321_s24 = smov 91   ;;  %vm623_vm2 = vcmask 736256  }
  0x3a   : > { %1062 = vmatprep.mubr.msk.bf16.mxu1 %vm1315_vm0, %v1314_v6  ;;  %v1518_v16 = vld [vmem:[%s1475_s22 + $0x20] sm:$0xff]  ;;  %s1322_s29 = smov 127   ;;  %s1323_s23 = smov 110   ;;  %vm560_vm3 = vcmask 891904   ;;  %vm591_vm4 = vcmask 752640   ;;  %vm530_vm5 = vcmask 1031168  }
  0x3b   : > { %v400_v38 = vld [vmem:[%s1725_s3] sm:$0x3]  ;;  %s1324_s11 = smov 19   ;;  %vm575_vm6 = vcmask 883712   ;;  %vm607_vm7 = vcmask 744448   ;;  %vm514_vm8 = vcmask 1039360  }
  0x3c   : > { %385 = vperm.xlu1 %1149, %v377_v3   ;;  %vm631_vm9 = vcmask 1043456   ;;  %vm546_vm10 = vcmask 900096   ;;  %vm703_vm11 = vcmask 154624   ;;  %vm723_vm12 = vcmask 1041408   ;;  %s1085_s18 = smul.u32 768, %s1399_s13  ;;  %s949_s22 = scalar_lea.sflag [#allocation4], %s1469_s17 }
  0x3d   : > { %367 = vperm.xlu0 %1148, %v359_v4   ;;  %vm719_vm13 = vcmask 293888   ;;  %vm839_vm14 = vcmask 31744   ;;  %p1742_p12 = scmp.ne.s32.totalorder %s1738_s20, 0 }
  0x3e   : > { %s1679_s26 = scalar_lea.hbm %s1731_s9, %s1085_s18 }
  0x41   : > { %407 = vperm.xlu0 %1148, %v404_v5  }
  0xb3   : > { %v381_v10 = vpop.permute.xlu1 %380 }
  0xb4   : > { %v363_v11 = vpop.permute.xlu0 %362 }
  0xb5   : > { %v370_v12 = vmul.f32 %v363_v11, %v1503_v7  ;;  %v371_v13 = vmul.f32 %v363_v11, %v1506_v8  ;;  %v372_v14 = vmul.f32 %v363_v11, %v1509_v9 }
  0xb7   : > { %v389_v19 = vadd.f32 %v381_v10, %v371_v13  ;;  %v390_v20 = vadd.f32 %v381_v10, %v372_v14  ;;  %v388_v24 = vadd.f32 %v381_v10, %v370_v12  ;;  %v386_v25 = vpop.permute.xlu1 %385 }
  0xb8   : > { %v368_v18 = vpop.permute.xlu0 %367 }
  0xb9   : > { %v373_v21 = vmul.f32 %v368_v18, %v1515_v15  ;;  %v374_v22 = vmul.f32 %v368_v18, %v1518_v16  ;;  %v375_v23 = vmul.f32 %v368_v18, %v1521_v17  ;;  %v395_v29 = vmax.f32 %v389_v19, 0.0 }
  0xba   : > { %v396_v30 = vmax.f32 %v390_v20, 0.0  ;;  %v394_v33 = vmax.f32 %v388_v24, 0.0 }
  0xbb   : > { %v392_v26 = vadd.f32 %v386_v25, %v374_v22  ;;  %v393_v27 = vadd.f32 %v386_v25, %v375_v23  ;;  %v391_v28 = vadd.f32 %v386_v25, %v373_v21 }
  0xbc   : > { %v408_v39 = vpop.permute.xlu0 %407 }
  0xbd   : > { %v398_v31 = vmax.f32 %v392_v26, 0.0  ;;  %v399_v32 = vmax.f32 %v393_v27, 0.0  ;;  %v397_v34 = vmax.f32 %v391_v28, 0.0 }
  0xbf   : > { %v402_v35 = vpack.c.bf16 %v398_v31, %v395_v29  ;;  %v403_v36 = vpack.c.bf16 %v399_v32, %v396_v30  ;;  %v401_v37 = vpack.c.bf16 %v397_v34, %v394_v33 }
  0xc1   : > { %428 = vmatprep.subr.bf16.mxu0 %v402_v35  ;;  %1061 = vmatpush3.bf16.msra.mxu1 %v403_v36 }
  0xc2   : > { %429 = vmatpush1.bf16.msra.mxu0 %v401_v37  ;;  %1066 = vmatprep.subr.bf16.mxu1 %v1314_v6 }
  0xc4   : > { %1063 = vmatmul.mubr.msk.bf16.vlgmr.msra.gmra.mxu1 %vm410_vm1, %v400_v38 }
  0xc5   : > { %1040 = vmatmul.mubr.msk.bf16.vlgmr.msra.gmra.mxu0 %vm410_vm1, %v400_v38  ;;  %1072 = vmatprep.mubr.msk.bf16.mxu1 %vm1315_vm0, %v1314_v6 }
  0xc6   : > { %765 = vmatprep.mubr.bf16.mxu0 %v1313_v0 }
 0x184   : > { %v489_v40 = vpop.f32.mrf.mxu1 }
 0x185   : > { %v490_v41 = vadd.f32 %v489_v40, %v408_v39  ;;  %v448_v42 = vpop.f32.mrf.mxu0 }
 0x186   : > { %v449_v43 = vadd.f32 %v448_v42, %v408_v39  ;;  %v1064_v44 = vpop.f32.mrf.mxu1 }
 0x187   : > { %v1533_v45 = vmax.f32 %v490_v41, 0.0  ;;  %v450_v46 = vpop.f32.mrf.mxu0 }
 0x188   : > { %v451_v47 = vadd.f32 %v450_v46, %v408_v39  ;;  %v492_v48 = vpop.f32.mrf.mxu1  ;;  %v1537_v51 = vmax.f32 %v449_v43, 0.0 }
 0x189   : > { %v452_v49 = vpop.f32.mrf.mxu0  ;;  %v1150_v50 = vpack.i.bf16 %v1314_v6, %v1533_v45  ;;  %v505_v57 = vrot.slane %v1533_v45, 4 }
 0x18a   : > { %v1539_v52 = vmax.f32 %v451_v47, 0.0  ;;  %v1065_v53 = vpop.f32.mrf.mxu1  ;;  %v503_v60 = vrot.slane %v1537_v51, 4 }
 0x18b   : > { %1151 = vrot.lane.b32.xlu0 %v1150_v50, %s1316_s27  ;;  %v453_v54 = vpop.f32.mrf.mxu0  ;;  %v1160_v59 = vpack.i.bf16 %v502_v56, %v505_v57 }
 0x18c   : > { %v1175_v55 = vpack.i.bf16 %v1539_v52, %v1537_v51  ;;  %v504_v58 = vrot.slane %v1539_v52, 4 }
 0x18e   : > { %1176 = vrot.lane.b32.xlu1 %v1175_v55, %s1316_s27  ;;  %v1195_v61 = vpack.i.bf16 %v504_v58, %v503_v60 }
 0x18f   : > { %558 = vrot.lane.b32.xlu0 %v1533_v45, %s1317_s28 }
 0x192   : > { %1181 = vrot.lane.b32.xlu1 %v1175_v55, %s1317_s28  ;;  %s1325_s28 = smov [#allocation5]  }
 0x193   : > { %587 = vrot.lane.b32.xlu0 %v1533_v45, %s1318_s14 }
 0x196   : > { %1186 = vrot.lane.b32.xlu1 %v1175_v55, %s1318_s14 }
 0x197   : > { %1156 = vrot.lane.b32.xlu0 %v1150_v50, %s1319_s16 }
 0x19a   : > { %1191 = vrot.lane.b32.xlu1 %v1175_v55, %s1319_s16 }
 0x19b   : > { %1161 = vrot.lane.b32.xlu0 %v1160_v59, %s1320_s19 }
 0x19e   : > { %1196 = vrot.lane.b32.xlu1 %v1195_v61, %s1320_s19 }
 0x19f   : > { %603 = vrot.lane.b32.xlu0 %v505_v57, %s1321_s24 }
 0x1a2   : > { %1201 = vrot.lane.b32.xlu1 %v1195_v61, %s1321_s24 }
 0x1a3   : > { %1166 = vrot.lane.b32.xlu0 %v1160_v59, %s1322_s29 }
 0x1a6   : > { %1206 = vrot.lane.b32.xlu1 %v1195_v61, %s1322_s29 }
 0x1a7   : > { %1171 = vrot.lane.b32.xlu0 %v1160_v59, %s1323_s23 }
 0x1aa   : > { %1211 = vrot.lane.b32.xlu1 %v1195_v61, %s1323_s23  ;;  %s350_s23 = scalar_lea.vmem [#allocation5], %s1084_s25 }
 0x1ab   : > { %605 = vrot.lane.b32.xlu0 %v502_v56, %s1321_s24 }
 0x1ae   : > { %589 = vrot.lane.b32.xlu1 %v1314_v6, %s1318_s14  ;;  %s1248_s14 = sshll.u32 %s1325_s28, 4  ;;  %s1249_s14 = int_to_ptr.vmem [resolvable:$false] %s1248_s14 }
 0x1af   : > { %s1250_s16 = scalar_lea.vmem %s1249_s14, 1536 }
 0x1fd   : > { %v1152_v62 = vpop.permute.xlu0 %1151 }
 0x1fe   : > { %v1154_v63 = vunpack.i.h.bf16 %v1152_v62  ;;  %v1153_v1 = vunpack.i.l.bf16 %v1152_v62 }
 0x200   : > { %v1177_v2 = vpop.permute.xlu1 %1176  ;;  %v626_v3 = vsel %vm623_vm2, %v1153_v1, %v1154_v63 }
 0x201   : > { %v1179_v4 = vunpack.i.h.bf16 %v1177_v2  ;;  %v1178_v5 = vunpack.i.l.bf16 %v1177_v2  ;;  %v1550_v10 = vpop.permute.xlu0 %558  ;;  %v660_v11 = vpack.c.bf16 %v626_v3, %v626_v3 }
 0x203   : > { %v657_v12 = vpack.c.bf16 %v1178_v5, %v1178_v5  ;;  %701 = vrot.lane.b32.xlu0 %v660_v11, %s1324_s11  ;;  %v624_v13 = vsel %vm623_vm2, %v1178_v5, %v1179_v4  ;;  %v625_v19 = vsel %vm623_vm2, %v1179_v4, %v1153_v1 }
 0x204   : > { %v1182_v14 = vpop.permute.xlu1 %1181  ;;  %v658_v18 = vpack.c.bf16 %v624_v13, %v624_v13  ;;  %v659_v21 = vpack.c.bf16 %v625_v19, %v625_v19 }
 0x205   : > { %v1553_v20 = vpop.permute.xlu0 %587  ;;  %695 = vrot.lane.b32.xlu1 %v657_v12, %s1324_s11  ;;  %v1184_v30 = vunpack.i.h.bf16 %v1182_v14  ;;  %v1183_v31 = vunpack.i.l.bf16 %v1182_v14 }
 0x207   : > { %697 = vrot.lane.b32.xlu0 %v658_v18, %s1324_s11  ;;  %v561_v39 = vsel %vm560_vm3, %v1183_v31, %v1184_v30  ;;  %v562_v60 = vsel %vm560_vm3, %v1184_v30, %v1550_v10 }
 0x208   : > { %v1187_v22 = vpop.permute.xlu1 %1186 }
 0x209   : > { %v1557_v23 = vpop.permute.xlu0 %1156  ;;  %699 = vrot.lane.b32.xlu1 %v659_v21, %s1324_s11  ;;  %v1189_v32 = vunpack.i.h.bf16 %v1187_v22  ;;  %v1188_v33 = vunpack.i.l.bf16 %v1187_v22 }
 0x20a   : > { %v1159_v1 = vunpack.i.h.bf16 %v1557_v23  ;;  %v1158_v2 = vunpack.i.l.bf16 %v1557_v23 }
 0x20b   : > { %v593_v40 = vsel %vm591_vm4, %v1189_v32, %v1553_v20  ;;  %v592_v41 = vsel %vm591_vm4, %v1188_v33, %v1189_v32 }
 0x20c   : > { %v1560_v24 = vpop.permute.xlu1 %1191 }
 0x20d   : > { %v1562_v25 = vpop.permute.xlu0 %1161  ;;  %v1194_v61 = vunpack.i.h.bf16 %v1560_v24  ;;  %v1193_v62 = vunpack.i.l.bf16 %v1560_v24 }
 0x20e   : > { %v1163_v42 = vunpack.i.l.bf16 %v1562_v25  ;;  %v1164_v63 = vunpack.i.h.bf16 %v1562_v25 }
 0x20f   : > { %v533_v23 = vsel %vm530_vm5, %v1194_v61, %v1158_v2  ;;  %v531_v24 = vsel %vm530_vm5, %v1159_v1, %v1193_v62  ;;  %v532_v25 = vsel %vm530_vm5, %v1193_v62, %v1194_v61 }
 0x210   : > { %v1197_v26 = vpop.permute.xlu1 %1196 }
 0x211   : > { %v1199_v27 = vunpack.i.h.bf16 %v1197_v26  ;;  %v1198_v28 = vunpack.i.l.bf16 %v1197_v26  ;;  %v1564_v29 = vpop.permute.xlu0 %603  ;;  %v578_v26 = vsel %vm575_vm6, %v1163_v42, %v1164_v63 }
 0x213   : > { %v576_v35 = vsel %vm575_vm6, %v1198_v28, %v1199_v27  ;;  %v640_v46 = vsel %vm631_vm9, %v1183_v31, %v1198_v28  ;;  %v577_v48 = vsel %vm575_vm6, %v1199_v27, %v1163_v42 }
 0x214   : > { %v1202_v34 = vpop.permute.xlu1 %1201  ;;  %v641_v53 = vsel %vm631_vm9, %v561_v39, %v576_v35  ;;  %v642_v4 = vsel %vm631_vm9, %v562_v60, %v577_v48 }
 0x215   : > { %v1204_v36 = vunpack.i.h.bf16 %v1202_v34  ;;  %v1203_v37 = vunpack.i.l.bf16 %v1202_v34  ;;  %v1567_v38 = vpop.permute.xlu0 %1166 }
 0x216   : > { %v1168_v3 = vunpack.i.l.bf16 %v1567_v38  ;;  %v1169_v5 = vunpack.i.h.bf16 %v1567_v38 }
 0x217   : > { %v609_v43 = vsel %vm607_vm7, %v1204_v36, %v1564_v29  ;;  %v608_v44 = vsel %vm607_vm7, %v1203_v37, %v1204_v36  ;;  %v644_v47 = vsel %vm631_vm9, %v1188_v33, %v1203_v37 }
 0x218   : > { %v1207_v49 = vpop.permute.xlu1 %1206  ;;  %v653_v50 = vpack.c.bf16 %v644_v47, %v640_v46  ;;  %v645_v54 = vsel %vm631_vm9, %v592_v41, %v608_v44  ;;  %v646_v59 = vsel %vm631_vm9, %v593_v40, %v609_v43  ;;  %v635_v47 = vsel %vm631_vm9, %v1533_v45, %v1168_v3 }
 0x219   : > { %v1209_v55 = vunpack.i.h.bf16 %v1207_v49  ;;  %v1208_v56 = vunpack.i.l.bf16 %v1207_v49  ;;  %v1172_v57 = vpop.permute.xlu0 %1171  ;;  %v654_v58 = vpack.c.bf16 %v645_v54, %v641_v53  ;;  %v655_v14 = vpack.c.bf16 %v646_v59, %v642_v4  ;;  %v822_v49 = vld [vmem:[%s1730_s8] sm:$0xff] }
 0x21a   : > { %687 = vrot.lane.b32.xlu1 %v653_v50, %s1324_s11  ;;  %v1174_v11 = vunpack.i.h.bf16 %v1172_v57  ;;  %v1173_v12 = vunpack.i.l.bf16 %v1172_v57 }
 0x21b   : > { %689 = vrot.lane.b32.xlu0 %v654_v58, %s1324_s11  ;;  %v517_v18 = vsel %vm514_vm8, %v1209_v55, %v1168_v3  ;;  %v516_v19 = vsel %vm514_vm8, %v1208_v56, %v1209_v55  ;;  %v515_v32 = vsel %vm514_vm8, %v1169_v5, %v1208_v56 }
 0x21c   : > { %v1212_v13 = vpop.permute.xlu1 %1211  ;;  %v634_v34 = vsel %vm631_vm9, %v1539_v52, %v517_v18  ;;  %v633_v36 = vsel %vm631_vm9, %v1537_v51, %v516_v19  ;;  %v643_v51 = vsel %vm631_vm9, %v1550_v10, %v578_v26  ;;  %v632_v52 = vsel %vm631_vm9, 0.0, %v515_v32  ;;  %v823_v10 = vld [vmem:[%s1730_s8 + $0x8] sm:$0xff] }
 0x21d   : > { %v1214_v21 = vunpack.i.h.bf16 %v1212_v13  ;;  %v1213_v22 = vunpack.i.l.bf16 %v1212_v13  ;;  %v606_v27 = vpop.permute.xlu0 %605  ;;  %v639_v46 = vsel %vm631_vm9, %v1158_v2, %v1173_v12 }
 0x21e   : > { %691 = vrot.lane.b32.xlu1 %v655_v14, %s1324_s11  ;;  %v610_v38 = vsel %vm607_vm7, %v1564_v29, %v606_v27  ;;  %v652_v48 = vpack.c.bf16 %v639_v46, %v635_v47  ;;  %v648_v14 = vld [vmem:[%s1727_s5] sm:$0x3] }
 0x21f   : > { %v549_v28 = vsel %vm546_vm10, %v1214_v21, %v1173_v12  ;;  %v547_v30 = vsel %vm546_vm10, %v1174_v11, %v1213_v22  ;;  %v548_v31 = vsel %vm546_vm10, %v1213_v22, %v1214_v21 }
 0x220   : > { %v590_v33 = vpop.permute.xlu1 %589  ;;  %v638_v35 = vsel %vm631_vm9, %v533_v23, %v549_v28  ;;  %v637_v37 = vsel %vm631_vm9, %v532_v25, %v548_v31  ;;  %v636_v43 = vsel %vm631_vm9, %v531_v24, %v547_v30 }
 0x221   : > { %v594_v39 = vsel %vm591_vm4, %v1553_v20, %v590_v33  ;;  %v651_v40 = vpack.c.bf16 %v638_v35, %v634_v34  ;;  %v650_v41 = vpack.c.bf16 %v637_v37, %v633_v36  ;;  %v649_v29 = vpack.c.bf16 %v636_v43, %v632_v52  ;;  %v661_v20 = vld [vmem:[%s1728_s6] sm:$0xf] }
 0x222   : > { %v647_v42 = vsel %vm631_vm9, %v594_v39, %v610_v38  ;;  %v1215_v38 = vld [vmem:[%s1729_s7] sm:$0xff]  }
 0x223   : > { %683 = vrot.lane.b32.xlu1 %v651_v40, %s1324_s11  ;;  %681 = vrot.lane.b32.xlu0 %v650_v41, %s1324_s11  ;;  %v656_v44 = vpack.c.bf16 %v647_v42, %v643_v51 }
 0x227   : > { %693 = vrot.lane.b32.xlu1 %v656_v44, %s1324_s11  ;;  %679 = vrot.lane.b32.xlu0 %v649_v29, %s1324_s11 }
 0x22b   : > { %664 = vperm.xlu1 %1149, %v661_v20   ;;  %685 = vrot.lane.b32.xlu0 %v652_v48, %s1324_s11  ;;  %s962_s11 = sshll.u32 %s350_s23, 4  ;;  %s1671_s11 = int_to_ptr.vmem [resolvable:$true] %s962_s11 }
 0x22c   : > { %s1244_s27 = scalar_lea.vmem %s1671_s11, 768  ;;  %p1251_p5 = scmp.lt.s32.totalorder %s1671_s11, %s1249_s14 }
 0x22d   : > { %p1245_p11 = scmp.ne.s32.totalorder %s1671_s11, %s1244_s27  ;;  %p1252_p7 = scmp.lt.s32.totalorder %s1250_s16, %s1244_s27 }
 0x22f   : > { %831 = vperm.xlu1 %1149, %v823_v10   ;;  %826 = vperm.xlu0 %1148, %v822_v49   ;;  %p1246_p13 = pnand %p1245_p11, %p1742_p12  ;;  %p1253_p8 = por %p1252_p7, %p1251_p5 }
 0x231   : > { %p1247_p4 = pneg %p1246_p13 }
 0x233   : > { %p1254_p10 = pnand %p1253_p8, %p1247_p4 }
 0x275   : > { %v702_v50 = vpop.permute.xlu0 %701 }
 0x277   : > { %v696_v53 = vpop.permute.xlu1 %695 }
 0x279   : > { %v698_v54 = vpop.permute.xlu0 %697 }
 0x27a   : > { %v710_v45 = vsel %vm703_vm11, %v696_v53, %v698_v54 }
 0x27b   : > { %v700_v55 = vpop.permute.xlu1 %699  ;;  %v725_v58 = vsel %vm723_vm12, %v710_v45, 0 }
 0x27c   : > { %v711_v56 = vsel %vm703_vm11, %v698_v54, %v700_v55  ;;  %v712_v57 = vsel %vm703_vm11, %v700_v55, %v702_v50 }
 0x27d   : > { %v731_v59 = vsel %vm723_vm12, %v712_v57, 0  ;;  %1042 = vmatprep.subr.msk.bf16.mxu0 %vm723_vm12, %v711_v56 }
 0x27e   : > { %744 = vmatpush1.bf16.msra.mxu0 %v725_v58  ;;  %1067 = vmatpush3.bf16.msra.mxu1 %v731_v59 }
 0x27f   : > { %1068 = vmatprep.subr.bf16.mxu1 %v1314_v6 }
 0x28c   : > { %v688_v60 = vpop.permute.xlu1 %687 }
 0x28d   : > { %v690_v61 = vpop.permute.xlu0 %689 }
 0x28e   : > { %v707_v1 = vsel %vm703_vm11, %v688_v60, %v690_v61 }
 0x290   : > { %v692_v62 = vpop.permute.xlu1 %691 }
 0x291   : > { %v708_v63 = vsel %vm703_vm11, %v690_v61, %v692_v62 }
 0x292   : > { %745 = vmatprep.subr.bf16.mxu0 %v708_v63 }
 0x293   : > { %746 = vmatpush1.bf16.msra.mxu0 %v707_v1 }
 0x295   : > { %v684_v2 = vpop.permute.xlu1 %683  ;;  %v682_v3 = vpop.permute.xlu0 %681 }
 0x296   : > { %v705_v4 = vsel %vm703_vm11, %v682_v3, %v684_v2 }
 0x297   : > { %747 = vmatprep.subr.bf16.mxu0 %v705_v4 }
 0x299   : > { %v694_v5 = vpop.permute.xlu1 %693  ;;  %v680_v11 = vpop.permute.xlu0 %679 }
 0x29a   : > { %v709_v12 = vsel %vm703_vm11, %v692_v62, %v694_v5  ;;  %v704_v13 = vsel %vm703_vm11, %v680_v11, %v682_v3 }
 0x29b   : > { %748 = vmatpush1.bf16.msra.mxu0 %v704_v13  ;;  %1069 = vmatpush3.bf16.msra.mxu1 %v709_v12 }
 0x29c   : > { %1070 = vmatprep.subr.bf16.mxu1 %v1314_v6 }
 0x29d   : > { %v686_v18 = vpop.permute.xlu0 %685 }
 0x29e   : > { %v706_v19 = vsel %vm703_vm11, %v684_v2, %v686_v18  ;;  %1043 = vmatmul.mubr.msk.bf16.vlgmr.msra.gmra.mxu0 %vm719_vm13, %v648_v14 }
 0x29f   : > { %1071 = vmatpush3.bf16.msra.mxu1 %v706_v19  ;;  %884 = vmatprep.mubr.bf16.mxu0 %v1313_v0 }
 0x2a0   : > { %1076 = vmatprep.subr.bf16.mxu1 %v1314_v6 }
 0x2a2   : > { %1073 = vmatmul.mubr.msk.bf16.vlgmr.msra.gmra.mxu1 %vm719_vm13, %v648_v14 }
 0x2a3   : > { %1078 = vmatprep.mubr.msk.bf16.mxu1 %vm1315_vm0, %v1314_v6 }
 0x2a6   : > { %v665_v21 = vpop.permute.xlu1 %664 }
 0x2aa   : > { %v827_v41 = vpop.permute.xlu0 %826  ;;  %v832_v44 = vpop.permute.xlu1 %831 }
 0x35e   : > { %v767_v22 = vpop.f32.mrf.mxu0 }
 0x35f   : > { %v768_v23 = vadd.f32 %v767_v22, %v665_v21 }
 0x360   : > { %v769_v24 = vpop.f32.mrf.mxu0 }
 0x361   : > { %v814_v25 = vmax.f32 %v768_v23, 0.0  ;;  %v770_v26 = vadd.f32 %v769_v24, %v665_v21 }
 0x362   : > { %v771_v27 = vpop.f32.mrf.mxu0  ;;  %v808_v28 = vpop.f32.mrf.mxu1 }
 0x363   : > { %v819_v30 = vpack.c.bf16 %v814_v25, %v814_v25  ;;  %v815_v31 = vmax.f32 %v770_v26, 0.0  ;;  %v809_v32 = vadd.f32 %v808_v28, %v665_v21 }
 0x364   : > { %v772_v33 = vpop.f32.mrf.mxu0  ;;  %v1074_v34 = vpop.f32.mrf.mxu1 }
 0x365   : > { %v820_v0 = vpack.c.bf16 %v815_v31, %v815_v31  ;;  %v816_v35 = vmax.f32 %v809_v32, 0.0  ;;  %v844_v6 = vsel %vm723_vm12, %v819_v30, 0 }
 0x366   : > { %v811_v36 = vpop.f32.mrf.mxu1 }
 0x367   : > { %v821_v37 = vpack.c.bf16 %v816_v35, %v816_v35  ;;  %1046 = vmatprep.subr.msk.bf16.mxu0 %vm723_vm12, %v820_v0 }
 0x368   : > { %v1075_v39 = vpop.f32.mrf.mxu1  ;;  %867 = vmatpush1.bf16.msra.mxu0 %v844_v6 }
 0x369   : > { %v850_v40 = vsel %vm723_vm12, %v821_v37, 0 }
 0x36a   : > { %1077 = vmatpush3.bf16.msra.mxu1 %v850_v40 }
 0x36b   : > { %1047 = vmatmul.mubr.msk.bf16.vlgmr.msra.gmra.mxu0 %vm839_vm14, %v1215_v38 }
 0x36d   : > { %1079 = vmatmul.mubr.msk.bf16.vlgmr.msra.gmra.mxu1 %vm839_vm14, %v1215_v38 }
 0x42b   : > { %v886_v42 = vpop.f32.mrf.mxu0 }
 0x42c   : > { %v887_v43 = vadd.f32 %v886_v42, %v827_v41 }
 0x42d   : > { %v888_v51 = vpop.f32.mrf.mxu0  ;;  %v929_v52 = vpop.f32.mrf.mxu1 }
 0x42e   : > { %v936_v29 = vadd.f32 %v887_v43, %v1503_v7  ;;  %v889_v46 = vadd.f32 %v888_v51, %v827_v41  ;;  %v930_v20 = vadd.f32 %v929_v52, %v827_v41 }
 0x42f   : > { %v890_v47 = vpop.f32.mrf.mxu0  ;;  %v1080_v48 = vpop.f32.mrf.mxu1 }
 0x430   : > { %942 = vst [vmem:[%s350_s23] sm:$0xff] %v936_v29  ;;  %v937_v10 = vadd.f32 %v889_v46, %v1506_v8  ;;  %v938_v49 = vadd.f32 %v930_v20, %v1509_v9  ;;  %v891_v50 = vadd.f32 %v890_v47, %v832_v44 }
 0x431   : > { %v892_v53 = vpop.f32.mrf.mxu0  ;;  %v932_v54 = vpop.f32.mrf.mxu1 }
 0x432   : > { %943 = vst [vmem:[%s350_s23 + $0x8] sm:$0xff] %v937_v10  ;;  %944 = vst [vmem:[%s350_s23 + $0x10] sm:$0xff] %v938_v49  ;;  %v939_v7 = vadd.f32 %v891_v50, %v1515_v15  ;;  %v893_v45 = vadd.f32 %v892_v53, %v832_v44  ;;  %v933_v55 = vadd.f32 %v932_v54, %v832_v44 }
 0x433   : > { %v1081_v56 = vpop.f32.mrf.mxu1 }
 0x434   : > { %945 = vst [vmem:[%s350_s23 + $0x18] sm:$0xff] %v939_v7  ;;  %v940_v8 = vadd.f32 %v893_v45, %v1518_v16  ;;  %v941_v9 = vadd.f32 %v933_v55, %v1521_v17 }
 0x436   : > { %946 = vst [vmem:[%s350_s23 + $0x20] sm:$0xff] %v940_v8  ;;  %947 = vst [vmem:[%s350_s23 + $0x28] sm:$0xff] %v941_v9 }
 0x437   : > { %1257 = shalt.err (!%p1254_p10)
}
 0x438   : > { %s1258_s19 = scalar_lea.hbm %s1679_s26, 768  ;;  %s1262_s23 = scalar_lea.hbm %s1731_s9, 1536 }
 0x439   : > { %p1259_p0 = scmp.ne.s32.totalorder %s1679_s26, %s1258_s19  ;;  %p1263_p1 = scmp.lt.s32.totalorder %s1679_s26, %s1731_s9 }
 0x43a   : > { %p1264_p3 = scmp.lt.s32.totalorder %s1262_s23, %s1258_s19 }
 0x43b   : > { %p1260_p2 = pnand %p1259_p0, %p1742_p12 }
 0x43c   : > { %p1265_p6 = por %p1264_p3, %p1263_p1 }
 0x43d   : > { %p1261_p9 = pneg %p1260_p2 }
 0x43f   : > { %p1266_p11 = pnand %p1265_p6, %p1261_p9 }
 0x441   : > { %1269 = shalt.err (!%p1266_p11)
}
 0x442   : > { %s1326_s25 = smov 384   ;;  %s1327_s27 = smov 24  }
 0x443   : > { %1088 = dma.vmem_to_hbm [thread:$0]  (%p1742_p12), %s1671_s11, 768, %s1679_s26, %s949_s22, %s1326_s25, %s1326_s25, %s1327_s27  }
 0x444 PF: > { %s977_s28 = sand.u32 1, %s1296_s30   ;;  %p1743_p13 = scmp.ne.s32.totalorder %s1739_s21, 0 }
 0x445   : > { %p1744_p4 = scmp.ge.s32.totalorder %s1308_s12, 2  ;;  %s978_s14 = scalar_lea.sflag [#allocation4], %s977_s28 }
 0x447   : > { %p1095_p5 = pnand %p1744_p4, %p1743_p13 }
 0x449   : > { %p1096_p7 = pneg %p1095_p5 }
 0x44b   : > { %1291 = dma.done.wait (%p1096_p7), %s978_s14, 768  }
 0x44c   : > { %1293 = vsyncadd (%p1096_p7), %s978_s14, 4294966528  ;;  %s1745_s16 = sld [smem:[#allocation8_spill]]  ;;  %p22_p8 = scmp.ge.s32.totalorder %s1403_s15, 4  }
 0x44d   : > { %s1746_s11 = sld [smem:[#allocation9_spill]]  ;;  %s1747_s30 = smov %s1300_s10 }
 0x44e   : > { %s1749_s12 = smov %s1403_s15  ;;  %24 = sbr.rel (!%p22_p8) target bundleno = 5 (0x5), region = 101 }
 0x452   : > { %s1748_s10 = smov %s1745_s16 }
 0x453   :  { %983 = vsyncpa [#allocation3], 1 }
 0x454   :  { %985 = vsyncpa [#allocation3 + $0x1], 1 }
 0x455   :  { %986 = vsyncpa [#allocation4], 1 }
 0x456   :  { %988 = vsyncpa [#allocation4 + $0x1], 1 }

</bundles_post_ra>
